<compile_context>
chip_gen: v7x
topology: tpu7x:2x2x1
jax: 0.10.0
libtpu: 0.0.40
codegen_flags: <defaults>
</compile_context>

<pallas_src>
import functools

import jax
import jax.numpy as jnp
import numpy as np
from jax.experimental import pallas as pl
from jax.experimental.pallas import tpu as pltpu

# ---- problem sizes implied by the module ----
OBS_DIM = 13          # get_model_predictions unpacks 13 state components
ACT_DIM = 2           # wheeled-robot action (throttle, steer)
HIDDENS = (32, 32)
N_MODELS = 5
BATCH = 8


# --------------------------------------------------------------------------- #
# Kernel: the whole 5-model ensemble as 3 packed MXU matmuls on one batch tile #
# --------------------------------------------------------------------------- #
def _ensemble_kernel(obs_ref, act_ref, w1o_ref, w1a_ref, w2_ref, w3_ref, b_ref, o_ref):
    """obs:[R,13] act:[R,2] f32 | w1o:[13,E*H1] w1a:[2,E*H1] w2:[E*H1,E*H2]
    w3:[E*H2,out_pad] bf16 (w2/w3 block-diagonal, w3 zero-padded to 128 lanes)
    b:[3,R,bw] f32 (pre-broadcast over rows) | o:[R,out_pad] f32."""
    cdt = w1o_ref.dtype                       # bf16 compute dtype
    h1w = w1o_ref.shape[1]                    # E*H1
    h2w = w2_ref.shape[1]                     # E*H2
    ow = w3_ref.shape[1]                      # padded output width (128)

    # Layer 1: cat([obs, act], -1) @ W1 expressed as two partial dots (exact same
    # math; avoids an unaligned in-kernel lane concat).
    z1 = (jnp.dot(obs_ref[...].astype(cdt), w1o_ref[...],
                  preferred_element_type=jnp.float32)
          + jnp.dot(act_ref[...].astype(cdt), w1a_ref[...],
                    preferred_element_type=jnp.float32)
          + b_ref[0, :, :h1w])
    h1 = jnp.tanh(z1)                                                   # [R, E*H1] f32

    h2 = jnp.tanh(
        jnp.dot(h1.astype(cdt), w2_ref[...], preferred_element_type=jnp.float32)
        + b_ref[1, :, :h2w])                                            # [R, E*H2] f32

    o_ref[...] = (
        jnp.dot(h2.astype(cdt), w3_ref[...], preferred_element_type=jnp.float32)
        + b_ref[2, :, :ow])                                             # [R, out_pad] f32


# --------------------------------------------------------------------------- #
# One-time packing (hoisted out of the per-step path; cache + reuse the result) #
# --------------------------------------------------------------------------- #
def _block_diag(w):
    """[E, In, Out] -> block-diagonal [E*In, E*Out] (exact zeros off-diagonal)."""
    E, I, O = w.shape
    eye = jnp.eye(E, dtype=w.dtype)
    return jnp.einsum("ef,eio->eifo", eye, w).reshape(E * I, E * O)


def pack_params(params, *, obs_dim, rows, weight_dtype=jnp.bfloat16):
    """Pack the ensemble into MXU-friendly slabs. Call ONCE per parameter update
    (not per forward step) and pass the cached result to ensemble_forward*.
    `rows` must equal the per-invocation batch-tile row count so the bias adds in
    the kernel are pure VPU adds (bias is pre-broadcast across rows)."""
    w1, b1, w2, b2, w3, b3 = params
    E, d_in, h1 = w1.shape
    h2 = w2.shape[-1]
    d_out = w3.shape[-1]

    w1_p = jnp.transpose(w1, (1, 0, 2)).reshape(d_in, E * h1).astype(weight_dtype)
    w1_obs = w1_p[:obs_dim]                                   # [obs_dim, E*H1]
    w1_act = w1_p[obs_dim:]                                   # [act_dim, E*H1]
    w2_p = _block_diag(w2).astype(weight_dtype)               # [E*H1, E*H2]

    w3_bd = _block_diag(w3)                                   # [E*H2, E*d_out]
    out_w = E * d_out
    out_pad = ((out_w + 127) // 128) * 128                    # lane-dense output slab
    w3_p = jnp.pad(w3_bd, ((0, 0), (0, out_pad - out_w))).astype(weight_dtype)

    # Single bias slab, f32, pre-broadcast over the batch rows: [3, rows, bw].
    bw = max(E * h1, E * h2, out_pad)
    bias_rows = []
    for b, width in ((b1, E * h1), (b2, E * h2), (b3, out_w)):
        row = jnp.pad(b.reshape(width).astype(jnp.float32), (0, bw - width))
        bias_rows.append(jnp.broadcast_to(row, (rows, bw)))
    bias = jnp.stack(bias_rows, axis=0)

    return (w1_obs, w1_act, w2_p, w3_p, bias)


# --------------------------------------------------------------------------- #
# Forward wrappers                                                             #
# --------------------------------------------------------------------------- #
def ensemble_forward_packed(obs, action, packed, *, batch_tile=None):
    """Fast path. Returns the lane-packed output [B, out_pad] (out_pad = 128);
    column e*d_out + j holds model e's output feature j. Consumers that can use
    this layout avoid the reshape/transpose epilogue entirely."""
    w1o, w1a, w2, w3, bias = packed
    obs = obs.astype(jnp.float32)
    action = action.astype(jnp.float32)
    B, obs_dim = obs.shape
    act_dim = action.shape[-1]
    assert w1o.shape[0] == obs_dim and w1a.shape[0] == act_dim
    h1w = w1o.shape[1]
    h2w = w2.shape[1]
    out_pad = w3.shape[1]

    flops = 2 * B * ((obs_dim + act_dim) * h1w + h1w * h2w + h2w * out_pad)
    cost = pl.CostEstimate(
        flops=int(flops),
        transcendentals=int(B * (h1w + h2w)),
        bytes_accessed=int(
            obs.size * 4 + action.size * 4 + bias.size * 4 + B * out_pad * 4
            + (w1o.size + w1a.size + w2.size + w3.size) * w1o.dtype.itemsize),
    )
    out_shape = jax.ShapeDtypeStruct((B, out_pad), jnp.float32)

    if batch_tile is None or batch_tile >= B:
        # Single invocation, no grid: at <1 MiB working set any grid step only
        # adds ~0.35 us overhead. Whole arrays pinned to VMEM explicitly.
        assert bias.shape[1] == B, "pack_params(rows=...) must match the batch size"
        vmem = pl.BlockSpec(memory_space=pltpu.MemorySpace.VMEM)
        return pl.pallas_call(
            _ensemble_kernel,
            out_shape=out_shape,
            in_specs=[vmem] * 7,
            out_specs=vmem,
            cost_estimate=cost,
        )(obs, action, w1o, w1a, w2, w3, bias)

    # Large-batch path (planner/rollout amortization): parallel 1-D grid over
    # batch tiles; constant index_maps keep packed weights/bias VMEM-resident
    # across tiles; on v7x the two TensorCores split the batch.
    assert B % batch_tile == 0 and batch_tile % 8 == 0
    assert bias.shape[1] == batch_tile, "pack_params(rows=...) must match batch_tile"
    return pl.pallas_call(
        _ensemble_kernel,
        out_shape=out_shape,
        grid=(B // batch_tile,),
        in_specs=[
            pl.BlockSpec((batch_tile, obs_dim), lambda i: (i, 0)),
            pl.BlockSpec((batch_tile, act_dim), lambda i: (i, 0)),
            pl.BlockSpec(w1o.shape, lambda i: (0, 0)),
            pl.BlockSpec(w1a.shape, lambda i: (0, 0)),
            pl.BlockSpec(w2.shape, lambda i: (0, 0)),
            pl.BlockSpec(w3.shape, lambda i: (0, 0)),
            pl.BlockSpec(bias.shape, lambda i: (0, 0, 0)),
        ],
        out_specs=pl.BlockSpec((batch_tile, out_pad), lambda i: (i, 0)),
        compiler_params=pltpu.CompilerParams(dimension_semantics=("parallel",)),
        cost_estimate=cost,
    )(obs, action, w1o, w1a, w2, w3, bias)


def ensemble_forward(obs, action, packed, *, n_models, d_out, batch_tile=None):
    """Module-equivalent output: [n_models, B, obs_dim] (torch.stack(..., dim=0))."""
    out = ensemble_forward_packed(obs, action, packed, batch_tile=batch_tile)
    B = obs.shape[0]
    return out[:, : n_models * d_out].reshape(B, n_models, d_out).transpose(1, 0, 2)


# --------------------------------------------------------------------------- #
# Init + references                                                            #
# --------------------------------------------------------------------------- #
def init_params(key, n_models=N_MODELS, d_in=OBS_DIM + ACT_DIM, hiddens=HIDDENS, d_out=OBS_DIM):
    """torch.nn.Linear default init (uniform +-1/sqrt(fan_in)) per ensemble member."""
    dims = (d_in,) + tuple(hiddens) + (d_out,)
    keys = jax.random.split(key, 2 * (len(dims) - 1))
    params = []
    for li in range(len(dims) - 1):
        fan_in, fan_out = dims[li], dims[li + 1]
        bound = 1.0 / np.sqrt(fan_in)
        W = jax.random.uniform(keys[2 * li], (n_models, fan_in, fan_out), jnp.float32, -bound, bound)
        b = jax.random.uniform(keys[2 * li + 1], (n_models, 1, fan_out), jnp.float32, -bound, bound)
        params += [W, b]
    return tuple(params)


def reference_forward(obs, action, params):
    """Pure-f32 mirror of the PyTorch module's forward (HIGHEST precision)."""
    hi = jax.lax.Precision.HIGHEST
    x = jnp.concatenate([obs, action], axis=-1)
    w1, b1, w2, b2, w3, b3 = params
    h = jnp.tanh(jnp.einsum("bi,eio->ebo", x, w1, precision=hi) + b1)
    h = jnp.tanh(jnp.einsum("ebi,eio->ebo", h, w2, precision=hi) + b2)
    return jnp.einsum("ebi,eio->ebo", h, w3, precision=hi) + b3


def reference_forward_bf16(obs, action, params):
    """Mirror of the kernel's mixed precision (bf16 operands, f32 accumulation)."""
    w1, b1, w2, b2, w3, b3 = params
    c = lambda a: a.astype(jnp.bfloat16)
    x = c(jnp.concatenate([obs, action], axis=-1))
    h = jnp.tanh(jnp.einsum("bi,eio->ebo", x, c(w1),
                            preferred_element_type=jnp.float32) + b1)
    h = jnp.tanh(jnp.einsum("ebi,eio->ebo", c(h), c(w2),
                            preferred_element_type=jnp.float32) + b2)
    return jnp.einsum("ebi,eio->ebo", c(h), c(w3),
                      preferred_element_type=jnp.float32) + b3


if __name__ == "__main__":
    key = jax.random.PRNGKey(0)
    k_obs, k_act, k_par, k_bobs, k_bact = jax.random.split(key, 5)

    obs = jax.random.normal(k_obs, (BATCH, OBS_DIM), jnp.float32)
    action = jax.random.normal(k_act, (BATCH, ACT_DIM), jnp.float32)
    params = init_params(k_par)

    # Pack ONCE and reuse across steps (re-pack only when params change).
    packed = pack_params(params, obs_dim=OBS_DIM, rows=BATCH)

    fwd = jax.jit(functools.partial(ensemble_forward, n_models=N_MODELS, d_out=OBS_DIM))
    out = jax.block_until_ready(fwd(obs, action, packed))
    assert out.shape == (N_MODELS, BATCH, OBS_DIM)

    # Kernel-math check (same bf16/f32 precision pipeline): tight tolerance.
    ref_bf16 = reference_forward_bf16(obs, action, params)
    np.testing.assert_allclose(np.asarray(out), np.asarray(ref_bf16), rtol=5e-3, atol=5e-3)
    # Semantic check vs full-f32 module math: tolerance reflects deliberate bf16 weights.
    ref_f32 = reference_forward(obs, action, params)
    np.testing.assert_allclose(np.asarray(out), np.asarray(ref_f32), rtol=5e-2, atol=8e-2)

    # Large-batch (planner/rollout) path: parallel grid over 256-row tiles.
    BIG, TILE = 512, 256
    obs_b = jax.random.normal(k_bobs, (BIG, OBS_DIM), jnp.float32)
    act_b = jax.random.normal(k_bact, (BIG, ACT_DIM), jnp.float32)
    packed_big = pack_params(params, obs_dim=OBS_DIM, rows=TILE)
    fwd_big = jax.jit(functools.partial(ensemble_forward, n_models=N_MODELS,
                                        d_out=OBS_DIM, batch_tile=TILE))
    out_big = jax.block_until_ready(fwd_big(obs_b, act_b, packed_big))
    assert out_big.shape == (N_MODELS, BIG, OBS_DIM)
    ref_big = reference_forward_bf16(obs_b, act_b, params)
    np.testing.assert_allclose(np.asarray(out_big), np.asarray(ref_big), rtol=5e-3, atol=5e-3)

    print("KERNEL_OK")
</pallas_src>

<mosaic_0001>
module attributes {stable_mosaic.version = 11 : i64} {
  func.func @_ensemble_kernel(%arg0: memref<8x13xf32, #tpu.memory_space<vmem>>, %arg1: memref<8x2xf32, #tpu.memory_space<vmem>>, %arg2: memref<13x160xbf16, #tpu.memory_space<vmem>>, %arg3: memref<2x160xbf16, #tpu.memory_space<vmem>>, %arg4: memref<160x160xbf16, #tpu.memory_space<vmem>>, %arg5: memref<160x128xbf16, #tpu.memory_space<vmem>>, %arg6: memref<3x8x160xf32, #tpu.memory_space<vmem>>, %arg7: memref<8x128xf32, #tpu.memory_space<vmem>>) attributes {dimension_semantics = [], scalar_prefetch = 0 : i64, scratch_operands = 0 : i64, tpu.core_type = #tpu.core_type<tc>} {
    %c0 = arith.constant 0 : index
    %c0_0 = arith.constant 0 : index
    %0 = vector.load %arg0[%c0, %c0_0] : memref<8x13xf32, #tpu.memory_space<vmem>>, vector<8x13xf32>
    %1 = arith.truncf %0 : vector<8x13xf32> to vector<8x13xbf16>
    %c0_1 = arith.constant 0 : index
    %c0_2 = arith.constant 0 : index
    %2 = vector.load %arg2[%c0_1, %c0_2] : memref<13x160xbf16, #tpu.memory_space<vmem>>, vector<13x160xbf16>
    %cst = arith.constant dense<0.000000e+00> : vector<8x160xf32>
    %3 = tpu.matmul %1, %2, %cst {dimension_numbers = #tpu.dot_dimension_numbers<[1], [0], [0], [1], [0, 0, 1, 1], [], []>} : vector<8x13xbf16>, vector<13x160xbf16>, vector<8x160xf32> -> vector<8x160xf32>
    %c0_3 = arith.constant 0 : index
    %c0_4 = arith.constant 0 : index
    %4 = vector.load %arg1[%c0_3, %c0_4] : memref<8x2xf32, #tpu.memory_space<vmem>>, vector<8x2xf32>
    %5 = arith.truncf %4 : vector<8x2xf32> to vector<8x2xbf16>
    %c0_5 = arith.constant 0 : index
    %c0_6 = arith.constant 0 : index
    %6 = vector.load %arg3[%c0_5, %c0_6] : memref<2x160xbf16, #tpu.memory_space<vmem>>, vector<2x160xbf16>
    %cst_7 = arith.constant dense<0.000000e+00> : vector<8x160xf32>
    %7 = tpu.matmul %5, %6, %cst_7 {dimension_numbers = #tpu.dot_dimension_numbers<[1], [0], [0], [1], [0, 0, 1, 1], [], []>} : vector<8x2xbf16>, vector<2x160xbf16>, vector<8x160xf32> -> vector<8x160xf32>
    %8 = arith.addf %3, %7 : vector<8x160xf32>
    %c0_8 = arith.constant 0 : index
    %c0_9 = arith.constant 0 : index
    %c0_10 = arith.constant 0 : index
    %9 = vector.load %arg6[%c0_8, %c0_9, %c0_10] : memref<3x8x160xf32, #tpu.memory_space<vmem>>, vector<1x8x160xf32>
    %10 = vector.shape_cast %9 : vector<1x8x160xf32> to vector<8x160xf32>
    %11 = arith.addf %8, %10 : vector<8x160xf32>
    %12 = math.tanh %11 : vector<8x160xf32>
    %13 = arith.truncf %12 : vector<8x160xf32> to vector<8x160xbf16>
    %c0_11 = arith.constant 0 : index
    %c0_12 = arith.constant 0 : index
    %14 = vector.load %arg4[%c0_11, %c0_12] : memref<160x160xbf16, #tpu.memory_space<vmem>>, vector<160x160xbf16>
    %cst_13 = arith.constant dense<0.000000e+00> : vector<8x160xf32>
    %15 = tpu.matmul %13, %14, %cst_13 {dimension_numbers = #tpu.dot_dimension_numbers<[1], [0], [0], [1], [0, 0, 1, 1], [], []>} : vector<8x160xbf16>, vector<160x160xbf16>, vector<8x160xf32> -> vector<8x160xf32>
    %c1 = arith.constant 1 : index
    %c0_14 = arith.constant 0 : index
    %c0_15 = arith.constant 0 : index
    %16 = vector.load %arg6[%c1, %c0_14, %c0_15] : memref<3x8x160xf32, #tpu.memory_space<vmem>>, vector<1x8x160xf32>
    %17 = vector.shape_cast %16 : vector<1x8x160xf32> to vector<8x160xf32>
    %18 = arith.addf %15, %17 : vector<8x160xf32>
    %19 = math.tanh %18 : vector<8x160xf32>
    %20 = arith.truncf %19 : vector<8x160xf32> to vector<8x160xbf16>
    %c0_16 = arith.constant 0 : index
    %c0_17 = arith.constant 0 : index
    %21 = vector.load %arg5[%c0_16, %c0_17] : memref<160x128xbf16, #tpu.memory_space<vmem>>, vector<160x128xbf16>
    %cst_18 = arith.constant dense<0.000000e+00> : vector<8x128xf32>
    %22 = tpu.matmul %20, %21, %cst_18 {dimension_numbers = #tpu.dot_dimension_numbers<[1], [0], [0], [1], [0, 0, 1, 1], [], []>} : vector<8x160xbf16>, vector<160x128xbf16>, vector<8x128xf32> -> vector<8x128xf32>
    %c2 = arith.constant 2 : index
    %c0_19 = arith.constant 0 : index
    %c0_20 = arith.constant 0 : index
    %23 = vector.load %arg6[%c2, %c0_19, %c0_20] : memref<3x8x160xf32, #tpu.memory_space<vmem>>, vector<1x8x128xf32>
    %24 = vector.shape_cast %23 : vector<1x8x128xf32> to vector<8x128xf32>
    %25 = arith.addf %22, %24 : vector<8x128xf32>
    %c0_21 = arith.constant 0 : index
    %c0_22 = arith.constant 0 : index
    %26 = vector.load %arg7[%c0_21, %c0_22] : memref<8x128xf32, #tpu.memory_space<vmem>>, vector<8x128xf32>
    tpu.vector_store %arg7[%c0_21, %c0_22], %25 {strides = array<i32>} : memref<8x128xf32, #tpu.memory_space<vmem>>, vector<8x128xf32>,
    return
  }
}

</mosaic_0001>

<bundles_post_ra>
// kernel: ensemble_forward.1
= control target key start
LH: loop header
LB: loop body
LE: loop exit
PB: predicated region body
PF: predicated region fallthrough
CT: control target
= control target key end

     0   :  { %12 = vsyncpa [#allocation3], 0  ;;  %s864_s0 = inlined_call_operand.hbm [shape: f32[8,13], index: 0, kind: input, shape index: {}]   ;;  %s865_s1 = inlined_call_operand.vmem [shape: f32[8,2], index: 1, kind: input, shape index: {}]   ;;  %s866_s2 = inlined_call_operand.vmem [shape: bf16[13,160], index: 2, kind: input, shape index: {}]   ;;  %s867_s3 = inlined_call_operand.vmem [shape: bf16[2,160], index: 3, kind: input, shape index: {}]   ;;  %s868_s4 = inlined_call_operand.hbm [shape: bf16[160,160], index: 4, kind: input, shape index: {}]   ;;  %s869_s5 = inlined_call_operand.hbm [shape: bf16[160,128], index: 5, kind: input, shape index: {}]   ;;  %s870_s6 = inlined_call_operand.hbm [shape: f32[3,8,160], index: 6, kind: input, shape index: {}]   ;;  %s871_s7 = inlined_call_operand.vmem [shape: f32[8,128], index: 7, kind: output, shape index: {}]  }
   0x1   :  { %13 = vsyncpa [#allocation5], 0 }
   0x2   :  { %14 = vsyncpa [#allocation8], 0  ;;  %s734_s24 = smov [#allocation4]   ;;  %s640_s28 = scalar_lea.hbm %s868_s4, 2560 }
   0x3   :  { %s36_s25 = sshll.u32 %s734_s24, 4  ;;  %p641_p0 = scmp.ne.s32.totalorder %s868_s4, %s640_s28  ;;  %s37_s25 = int_to_ptr.vmem [resolvable:$true] %s36_s25 }
   0x4   :  { %p644_p1 = scmp.lt.u32.totalorder %s640_s28, %s868_s4 }
   0x6   :  { %p646_p2 = pnand %p644_p1, %p641_p0 }
   0x8   :  { %649 = shalt.err (!%p646_p2)
}
   0x9   :  { %s650_s10 = scalar_lea.vmem %s37_s25, 2560  ;;  %p655_p4 = scmp.lt.s32.totalorder %s37_s25, %s37_s25 }
   0xa   :  { %p651_p3 = scmp.ne.s32.totalorder %s37_s25, %s650_s10  ;;  %p656_p5 = scmp.lt.s32.totalorder %s650_s10, %s650_s10 }
   0xc   :  { %p657_p6 = por %p656_p5, %p655_p4 }
   0xe   :  { %p658_p7 = pnand %p657_p6, %p651_p3 }
  0x10   :  { %661 = shalt.err (!%p658_p7)
}
  0x11   :  { %s735_s11 = smov 128   ;;  %s736_s12 = smov 8  }
  0x12   :  { %42 = dma.hbm_to_vmem [thread:$0]  %s868_s4, 2560, %s37_s25, [#allocation5], %s735_s11, %s735_s11, %s736_s12  }
  0x13   :  { %s737_s15 = smov [#allocation2]   ;;  %s738_s17 = smov [#allocation6]  }
  0x14   :  { %s21_s16 = sshll.u32 %s737_s15, 4  ;;  %s48_s18 = sshll.u32 %s738_s17, 4  ;;  %s22_s16 = int_to_ptr.vmem [resolvable:$true] %s21_s16  ;;  %s49_s18 = int_to_ptr.vmem [resolvable:$true] %s48_s18 }
  0x15   :  { %s662_s21 = scalar_lea.hbm %s864_s0, 128 }
  0x16   :  { %p663_p8 = scmp.ne.s32.totalorder %s864_s0, %s662_s21  ;;  %p666_p9 = scmp.lt.u32.totalorder %s662_s21, %s864_s0 }
  0x18   :  { %p668_p10 = pnand %p666_p9, %p663_p8 }
  0x1a   :  { %671 = shalt.err (!%p668_p10)
}
  0x1b   :  { %s672_s4 = scalar_lea.vmem %s22_s16, 128  ;;  %p677_p12 = scmp.lt.s32.totalorder %s22_s16, %s22_s16 }
  0x1c   :  { %p673_p11 = scmp.ne.s32.totalorder %s22_s16, %s672_s4  ;;  %p678_p13 = scmp.lt.s32.totalorder %s672_s4, %s672_s4 }
  0x1e   :  { %p679_p0 = por %p678_p13, %p677_p12 }
  0x20   :  { %p680_p1 = pnand %p679_p0, %p673_p11 }
  0x22   :  { %683 = shalt.err (!%p680_p1)
}
  0x23   :  { %24 = dma.hbm_to_vmem [thread:$0]  %s864_s0, 128, %s22_s16, [#allocation3]  }
  0x24   :  { %s684_s30 = scalar_lea.hbm %s869_s5, 1280 }
  0x25   :  { %p685_p2 = scmp.ne.s32.totalorder %s869_s5, %s684_s30  ;;  %p688_p3 = scmp.lt.u32.totalorder %s684_s30, %s869_s5 }
  0x27   :  { %p690_p4 = pnand %p688_p3, %p685_p2 }
  0x29   :  { %693 = shalt.err (!%p690_p4)
}
  0x2a   :  { %s694_s12 = scalar_lea.vmem %s49_s18, 1280  ;;  %p699_p6 = scmp.lt.s32.totalorder %s49_s18, %s49_s18 }
  0x2b   :  { %p695_p5 = scmp.ne.s32.totalorder %s49_s18, %s694_s12  ;;  %p700_p7 = scmp.lt.s32.totalorder %s694_s12, %s694_s12 }
  0x2d   :  { %p701_p8 = por %p700_p7, %p699_p6 }
  0x2f   :  { %p702_p9 = pnand %p701_p8, %p695_p5 }
  0x31   :  { %705 = shalt.err (!%p702_p9)
}
  0x32   :  { %s739_s0 = smov 64   ;;  %s740_s13 = smov 4  }
  0x33   :  { %54 = dma.hbm_to_vmem [thread:$0]  %s869_s5, 1280, %s49_s18, [#allocation5], %s739_s0, %s739_s0, %s740_s13  }
  0x34   :  { %s741_s16 = smov [#allocation7]   ;;  %s706_s21 = scalar_lea.hbm %s870_s6, 768 }
  0x35   :  { %s60_s17 = sshll.u32 %s741_s16, 4  ;;  %p707_p10 = scmp.ne.s32.totalorder %s870_s6, %s706_s21  ;;  %s61_s17 = int_to_ptr.vmem [resolvable:$true] %s60_s17 }
  0x36   :  { %p710_p11 = scmp.lt.u32.totalorder %s706_s21, %s870_s6 }
  0x38   :  { %p712_p12 = pnand %p710_p11, %p707_p10 }
  0x3a   :  { %715 = shalt.err (!%p712_p12)
}
  0x3b   :  { %s716_s4 = scalar_lea.vmem %s61_s17, 768  ;;  %p721_p0 = scmp.lt.s32.totalorder %s61_s17, %s61_s17 }
  0x3c   :  { %p717_p13 = scmp.ne.s32.totalorder %s61_s17, %s716_s4  ;;  %p722_p1 = scmp.lt.s32.totalorder %s716_s4, %s716_s4 }
  0x3e   :  { %p723_p2 = por %p722_p1, %p721_p0 }
  0x40   :  { %p724_p3 = pnand %p723_p2, %p717_p13 }
  0x42   :  { %727 = shalt.err (!%p724_p3)
}
  0x43   :  { %s742_s5 = smov 256   ;;  %s743_s18 = smov 16  }
  0x44   :  { %66 = dma.hbm_to_vmem [thread:$0]  %s870_s6, 768, %s61_s17, [#allocation8], %s742_s5, %s742_s5, %s743_s18  }
  0x45   :  { %728 = dma.done.wait [#allocation3], 128  }
  0x46   :  { %729 = vsyncadd [#allocation3], 4294967168 }
  0x47   :  { %730 = dma.done.wait [#allocation5], 3840  }
  0x48   :  { %731 = vsyncadd [#allocation5], 4294963456 }
  0x49   :  { %732 = dma.done.wait [#allocation8], 768  }
  0x4a   :  { %733 = vsyncadd [#allocation8], 4294966528  ;;  %v99_v0 = vlaneseq  ;;  %vm174_vm0 = vcmask 1045504   ;;  %v744_v1 = vmov 1966171168   ;;  %v745_v4 = vmov 0  }
  0x4b   :  { %v97_v2 = vunpack.c.l.s4 %v744_v1  ;;  %153 = vmatprep.mubr.bf16.mxu0 %v745_v4  ;;  %216 = vmatprep.mubr.bf16.mxu1 %v745_v4  ;;  %vm175_vm1 = vcmask 1046528   ;;  %v746_v6 = vmov 65535   ;;  %vm114_vm2 = vcmask 1040384   ;;  %v84_v11 = vld [vmem:[%s865_s1] sm:$0xff]  ;;  %v594_v20 = vld [vmem:[#allocation4 + $0x4] ss:$8 sps:$4 sm:$0xff]  }
  0x4c   :  { %v100_v3 = vshrl.u32 %v99_v0, 7  ;;  %v176_v7 = vsel %vm174_vm0, 4294967295, %v746_v6  ;;  %v538_v10 = vld.sshfl [vmem:[%s867_s3] sm:$0x11 pattern:$0x75316420]  ;;  %v85_v22 = vpack.c.bf16 %v84_v11, %v84_v11 }
  0x4d   :  { %v98_v5 = vunpack.c.0.s8 %v97_v2  ;;  %v177_v9 = vsel %vm175_vm1, %v176_v7, 0  ;;  %v95_v12 = vcombine.high %v538_v10, %v538_v10  ;;  %v589_v13 = vld [vmem:[%s866_s2 + $0x4] ss:$8 sps:$4 sm:$0x7f]   ;;  %vm110_vm3 = vcmask 15360   ;;  %v623_v44 = vld [vmem:[#allocation6 + $0x8] sm:$0xff]  }
  0x4e   :  { %v80_v15 = vld [vmem:[#allocation2] sm:$0xff]  ;;  %v182_v18 = vand.u32 %v589_v13, %v177_v9  ;;  %vm170_vm4 = vcmask 105472   ;;  %v592_v24 = vld [vmem:[#allocation4] ss:$8 sps:$4 sm:$0xff]   ;;  %v600_v27 = vld [vmem:[#allocation4 + $0x24] ss:$8 sps:$4 sm:$0xff]  }
  0x4f   :  { %v101_v8 = vsub.s32 %v98_v5, %v100_v3  ;;  %v591_v16 = vld [vmem:[%s866_s2] ss:$8 sps:$4 sm:$0x7f]   ;;  %v81_v23 = vpack.c.bf16 %v80_v15, %v80_v15  ;;  %v597_v25 = vld [vmem:[#allocation4 + $0x14] ss:$8 sps:$4 sm:$0xff]   ;;  %v627_v48 = vld [vmem:[#allocation6 + $0x28] sm:$0xff]  }
  0x50   :  { %v179_v21 = vand.u32 %v591_v16, %v177_v9  ;;  %184 = vmatprep.subr.bf16.mxu1 %v182_v18  ;;  %v595_v26 = vld [vmem:[#allocation4 + $0x10] ss:$8 sps:$4 sm:$0xff]   ;;  %v598_v28 = vld [vmem:[#allocation4 + $0x20] ss:$8 sps:$4 sm:$0xff]   ;;  %v603_v29 = vld [vmem:[#allocation4 + $0x34] ss:$8 sps:$4 sm:$0xff]  }
  0x51   :  { %v102_v14 = vrot.slane %v538_v10, %v101_v8  ;;  %v109_v17 = vrot.slane %v95_v12, %v101_v8  ;;  %v601_v30 = vld [vmem:[#allocation4 + $0x30] ss:$8 sps:$4 sm:$0xff]   ;;  %v606_v31 = vld [vmem:[#allocation4 + $0x44] ss:$8 sps:$4 sm:$0xff]   ;;  %v604_v32 = vld [vmem:[#allocation4 + $0x40] ss:$8 sps:$4 sm:$0xff]  }
  0x52   :  { %185 = vmatpush1.bf16.msra.mxu1 %v179_v21  ;;  %v609_v33 = vld [vmem:[#allocation4 + $0x54] ss:$8 sps:$4 sm:$0xff]   ;;  %v607_v34 = vld [vmem:[#allocation4 + $0x50] ss:$8 sps:$4 sm:$0xff]   ;;  %v612_v35 = vld [vmem:[#allocation4 + $0x64] ss:$8 sps:$4 sm:$0xff]  }
  0x53   :  { %v116_v19 = vsel %vm114_vm2, %v102_v14, 0  ;;  %539 = vmatprep.subr.msk.bf16.mxu0 %vm114_vm2, %v109_v17  ;;  %490 = vmatprep.subr.bf16.mxu1 %v745_v4  ;;  %v610_v36 = vld [vmem:[#allocation4 + $0x60] ss:$8 sps:$4 sm:$0xff]   ;;  %v615_v37 = vld [vmem:[#allocation4 + $0x74] ss:$8 sps:$4 sm:$0xff]   ;;  %vm356_vm5 = vcmask 261120  }
  0x54   :  { %122 = vmatpush1.bf16.msra.mxu0 %v116_v19  ;;  %v613_v38 = vld [vmem:[#allocation4 + $0x70] ss:$8 sps:$4 sm:$0xff]   ;;  %v618_v39 = vld [vmem:[#allocation4 + $0x84] ss:$8 sps:$4 sm:$0xff]   ;;  %v616_v40 = vld [vmem:[#allocation4 + $0x80] ss:$8 sps:$4 sm:$0xff]  }
  0x55   :  { %360 = vmatprep.subr.bf16.mxu0 %v594_v20  ;;  %543 = vmatmul.mubr.msk.bf16.vlgmr.msra.gmra.mrb[0].mxu1 %vm170_vm4, %v81_v23  ;;  %v621_v41 = vld [vmem:[#allocation4 + $0x94] ss:$8 sps:$4 sm:$0xff]   ;;  %v619_v42 = vld [vmem:[#allocation4 + $0x90] ss:$8 sps:$4 sm:$0xff]   ;;  %v622_v43 = vld [vmem:[#allocation6] sm:$0xff]  }
  0x56   :  { %491 = vmatpush1.bf16.msra.mxu1 %v622_v43  ;;  %v624_v45 = vld [vmem:[#allocation6 + $0x10] sm:$0xff]   ;;  %v625_v46 = vld [vmem:[#allocation6 + $0x18] sm:$0xff]   ;;  %v626_v47 = vld [vmem:[#allocation6 + $0x20] sm:$0xff]  }
  0x57   :  { %540 = vmatmul.mubr.msk.bf16.vlgmr.msra.gmra.mrb[0].mxu0 %vm110_vm3, %v85_v22  ;;  %492 = vmatprep.subr.bf16.mxu1 %v745_v4  ;;  %v225_v51 = vld [vmem:[#allocation7] sm:$0xff]  ;;  %v226_v55 = vld [vmem:[#allocation7 + $0x8] sm:$0xff]  ;;  %v630_v6 = vld [vmem:[#allocation6 + $0x40] sm:$0xff]  }
  0x58   :  { %361 = vmatpush1.bf16.msra.mxu0 %v592_v24  ;;  %v628_v3 = vld [vmem:[#allocation6 + $0x30] sm:$0xff]   ;;  %v629_v5 = vld [vmem:[#allocation6 + $0x38] sm:$0xff]   ;;  %v631_v7 = vld [vmem:[#allocation6 + $0x48] sm:$0xff]  }
  0x59   :  { %362 = vmatprep.subr.bf16.mxu0 %v597_v25  ;;  %v254_v8 = vld [vmem:[#allocation7 + $0x10] sm:$0xff]  ;;  %v255_v9 = vld [vmem:[#allocation7 + $0x18] sm:$0xff] }
  0x5a   :  { %493 = vmatpush1.bf16.msra.mxu1 %v623_v44 }
  0x5b   :  { %494 = vmatprep.subr.bf16.mxu1 %v745_v4 }
  0x5c   :  { %363 = vmatpush1.bf16.msra.mxu0 %v595_v26 }
  0x5d   :  { %364 = vmatprep.subr.bf16.mxu0 %v600_v27 }
  0x5e   :  { %495 = vmatpush1.bf16.msra.mxu1 %v624_v45 }
  0x5f   :  { %496 = vmatprep.subr.bf16.mxu1 %v745_v4 }
  0x60   :  { %365 = vmatpush1.bf16.msra.mxu0 %v598_v28 }
  0x61   :  { %366 = vmatprep.subr.bf16.mxu0 %v603_v29 }
  0x62   :  { %497 = vmatpush1.bf16.msra.mxu1 %v625_v46 }
  0x63   :  { %498 = vmatprep.subr.bf16.mxu1 %v745_v4 }
  0x64   :  { %367 = vmatpush1.bf16.msra.mxu0 %v601_v30 }
  0x65   :  { %368 = vmatprep.subr.bf16.mxu0 %v606_v31 }
  0x66   :  { %499 = vmatpush1.bf16.msra.mxu1 %v626_v47 }
  0x67   :  { %500 = vmatprep.subr.bf16.mxu1 %v745_v4 }
  0x68   :  { %369 = vmatpush1.bf16.msra.mxu0 %v604_v32 }
  0x69   :  { %370 = vmatprep.subr.bf16.mxu0 %v609_v33 }
  0x6a   :  { %501 = vmatpush1.bf16.msra.mxu1 %v627_v48 }
  0x6b   :  { %502 = vmatprep.subr.bf16.mxu1 %v745_v4 }
  0x6c   :  { %371 = vmatpush1.bf16.msra.mxu0 %v607_v34 }
  0x6d   :  { %372 = vmatprep.subr.bf16.mxu0 %v612_v35 }
  0x6e   :  { %503 = vmatpush1.bf16.msra.mxu1 %v628_v3 }
  0x6f   :  { %504 = vmatprep.subr.bf16.mxu1 %v745_v4 }
  0x70   :  { %373 = vmatpush1.bf16.msra.mxu0 %v610_v36 }
  0x71   :  { %374 = vmatprep.subr.bf16.mxu0 %v615_v37 }
  0x72   :  { %505 = vmatpush1.bf16.msra.mxu1 %v629_v5 }
  0x73   :  { %506 = vmatprep.subr.bf16.mxu1 %v745_v4 }
  0x74   :  { %375 = vmatpush1.bf16.msra.mxu0 %v613_v38 }
  0x75   :  { %376 = vmatprep.subr.bf16.mxu0 %v618_v39 }
  0x76   :  { %507 = vmatpush1.bf16.msra.mxu1 %v630_v6 }
  0x77   :  { %508 = vmatprep.subr.bf16.mxu1 %v745_v4  ;;  %v426_v4 = vld [vmem:[#allocation7 + $0x20] sm:$0xff] }
  0x78   :  { %377 = vmatpush1.bf16.msra.mxu0 %v616_v40 }
  0x79   :  { %378 = vmatprep.subr.bf16.mxu0 %v621_v41 }
  0x7a   :  { %509 = vmatpush1.bf16.msra.mxu1 %v631_v7 }
  0x7c   :  { %379 = vmatpush1.bf16.msra.mxu0 %v619_v42 }
 0x128   :  { %v218_v50 = vpop.f32.mrb[0].mxu1 }
 0x129   :  { %v220_v54 = vpop.f32.mrb[1].mxu1 }
 0x12a   :  { %v155_v49 = vpop.f32.mrb[0].mxu0  ;;  %v222_v58 = vpop.f32.mrb[2].mxu1 }
 0x12b   :  { %v219_v52 = vadd.f32 %v218_v50, %v155_v49  ;;  %v157_v53 = vpop.f32.mrb[1].mxu0  ;;  %v223_v61 = vpop.f32.mrb[3].mxu1 }
 0x12c   :  { %v221_v56 = vadd.f32 %v220_v54, %v157_v53  ;;  %v159_v57 = vpop.f32.mrb[2].mxu0 }
 0x12d   :  { %v227_v59 = vadd.f32 %v225_v51, %v219_v52  ;;  %v160_v60 = vpop.f32.mrb[3].mxu0 }
 0x12e   :  { %v228_v62 = vadd.f32 %v226_v55, %v221_v56 }
 0x12f   :  { %632 = vtanh.f32 %v227_v59 }
 0x130   :  { %634 = vtanh.f32 %v228_v62 }
 0x139   :  { %v633_v63 = vpop.eup %632 }
 0x13a   :  { %v635_v0 = vpop.eup %634  ;;  %v231_v2 = vpack.c.bf16 %v633_v63, %v633_v63 }
 0x13b   :  { %v232_v1 = vpack.c.bf16 %v635_v0, %v635_v0 }
 0x13d   :  { %564 = vmatprep.mubr.msk.bf16.mxu0 %vm356_vm5, %v232_v1 }
 0x13e   :  { %393 = vmatmul.mubr.bf16.vlgmr.msra.gmra.mrb[4].mxu0 %v231_v2 }
 0x211   :  { %v394_v10 = vpop.f32.mrb[4].mxu0 }
 0x212   :  { %v395_v11 = vadd.f32 %v394_v10, %v254_v8  ;;  %v396_v12 = vpop.f32.mrb[5].mxu0 }
 0x213   :  { %v397_v13 = vadd.f32 %v396_v12, %v255_v9  ;;  %v398_v14 = vpop.f32.mrb[6].mxu0 }
 0x214   :  { %636 = vtanh.f32 %v395_v11  ;;  %v399_v15 = vpop.f32.mrb[7].mxu0 }
 0x215   :  { %638 = vtanh.f32 %v397_v13 }
 0x21e   :  { %v637_v16 = vpop.eup %636 }
 0x21f   :  { %v639_v17 = vpop.eup %638  ;;  %v403_v19 = vpack.c.bf16 %v637_v16, %v637_v16 }
 0x220   :  { %v404_v18 = vpack.c.bf16 %v639_v17, %v639_v17 }
 0x222   :  { %575 = vmatprep.mubr.msk.bf16.mxu1 %vm356_vm5, %v404_v18 }
 0x223   :  { %523 = vmatmul.mubr.bf16.vlgmr.msra.gmra.mrb[4].mxu1 %v403_v19 }
 0x2f6   :  { %v524_v20 = vpop.f32.mrb[4].mxu1 }
 0x2f7   :  { %v525_v21 = vadd.f32 %v524_v20, %v426_v4  ;;  %v526_v22 = vpop.f32.mrb[5].mxu1 }
 0x2f8   :  { %v527_v23 = vpop.f32.mrb[6].mxu1 }
 0x2f9   :  { %530 = vst [vmem:[%s871_s7] sm:$0xff] %v525_v21  ;;  %v528_v24 = vpop.f32.mrb[7].mxu1 }
 0x2fa   :  { %535 = vsyncpa [#allocation3], 1 }
 0x2fb   :  { %536 = vsyncpa [#allocation5], 1 }
 0x2fc   :  { %537 = vsyncpa [#allocation8], 1 }

</bundles_post_ra>
